<compile_context>
chip_gen: v7x
topology: tpu7x:2x2x1
jax: 0.10.0
libtpu: 0.0.40
codegen_flags: <defaults>
</compile_context>

<pallas_src>
import functools

import jax
import jax.numpy as jnp
from jax.experimental import pallas as pl
from jax.experimental.pallas import tpu as pltpu


def _gcn_fused_kernel(x_ref, adj_ref, *rest, num_layers, f_outs, adj_first, eps):
    """Fused GCN stack for one block of Bt batch elements.

    x_ref:   (Bt, Np, F0p)  f32 VMEM (feature-padded input)
    adj_ref: (Bt, Np, Np)   f32 VMEM
    rest:    w_refs[0..L-1] (Fin_p, Fout_p) bf16 VMEM,
             o_ref (Bt, Np, Flast_p) f32,
             adj_scr (Bt, Np, Np) bf16 VMEM scratch
    """
    w_refs = rest[:num_layers]
    o_ref = rest[num_layers]
    adj_scr = rest[num_layers + 1]

    Bt, N, _ = x_ref.shape

    # Cast the adjacency tile to bf16 exactly once per grid step into VMEM
    # scratch; each layer re-reads it from VMEM at its point of use (cheap vld)
    # instead of holding a big live value across the whole layer stack.
    adj_scr[...] = adj_ref[...].astype(jnp.bfloat16)

    # Activations kept as a 2-D (Bt*N, F) slab: full sublanes for VPU work and
    # a real M dimension for the h @ W matmul.
    h2 = x_ref[...].reshape(Bt * N, x_ref.shape[-1])  # f32

    for idx in range(num_layers):
        w = w_refs[idx][...]                      # (Fin_p, Fout_p) bf16, pre-cast
        f_out_p = w.shape[-1]
        adj = adj_scr[...]                        # bf16, re-read per layer
        h_b = h2.astype(jnp.bfloat16)

        if adj_first[idx]:
            # (adj @ h) @ W : smaller feature dim rides the O(N^2) bmm term.
            hx = jnp.einsum("bnm,bmf->bnf", adj, h_b.reshape(Bt, N, -1),
                            preferred_element_type=jnp.float32)
            agg2 = jnp.dot(hx.reshape(Bt * N, -1).astype(jnp.bfloat16), w,
                           preferred_element_type=jnp.float32)     # (Bt*N, Fout_p)
        else:
            # adj @ (h @ W)
            support = jnp.dot(h_b, w, preferred_element_type=jnp.float32)
            agg = jnp.einsum("bnm,bmf->bnf", adj,
                             support.reshape(Bt, N, f_out_p).astype(jnp.bfloat16),
                             preferred_element_type=jnp.float32)
            agg2 = agg.reshape(Bt * N, f_out_p)

        # LayerNorm (no affine, eps=1e-5), single fused reduction pass.
        # Padded feature columns of agg2 are exactly zero (zero weight columns),
        # so sums over the padded width equal sums over the true width; divide
        # by the TRUE feature count.
        inv_f = 1.0 / float(f_outs[idx])
        s1 = jnp.sum(agg2, axis=-1, keepdims=True)
        s2 = jnp.sum(agg2 * agg2, axis=-1, keepdims=True)
        mean = s1 * inv_f
        var = jnp.maximum(s2 * inv_f - mean * mean, 0.0)
        h2 = jnp.maximum((agg2 - mean) * jax.lax.rsqrt(var + eps), 0.0)
        # Dropout(p=0.1): identity in eval mode.

    o_ref[...] = h2.reshape(Bt, N, -1).astype(o_ref.dtype)


def _ceil_to(v, m):
    return ((v + m - 1) // m) * m


def _estimate_vmem_bytes(bt, Np, f_pad, num_layers):
    """Rough per-grid-step VMEM footprint (double-buffered tiles + scratch)."""
    f_max = max(f_pad)
    w_bytes = sum(f_pad[i] * f_pad[i + 1] * 2 for i in range(num_layers))  # bf16
    io_tiles = (bt * Np * Np * 4 * 2            # adj f32 tile, double-buffered
                + bt * Np * f_pad[0] * 4 * 2    # x tile, double-buffered
                + bt * Np * f_pad[-1] * 4 * 2)  # output tile, double-buffered
    adj_scr = bt * Np * Np * 2                  # bf16 adjacency scratch
    live = 6 * bt * Np * f_max * 4              # in-flight activation slabs
    return io_tiles + adj_scr + w_bytes + live


def _pick_batch_block(B, Np, f_pad, num_layers, budget, multi_core):
    """Largest divisor of B fitting the VMEM budget. On multi-TensorCore chips
    (v7x) keep >=2 grid steps when B >= 2 so the parallel axis shards across
    both cores; on single-TC chips (v5e/v6e) use the biggest feasible block."""
    for d in range(B, 0, -1):
        if B % d != 0:
            continue
        if multi_core and B >= 2 and d > B // 2:
            continue
        if _estimate_vmem_bytes(d, Np, f_pad, num_layers) <= budget:
            return d
    return None


def gcn_forward(x, adj, weights, *, batch_block=None):
    """Fused GCN forward.

    x:       (B, N, F_in) f32
    adj:     (B, N, N)    f32
    weights: list of (F_in_l, F_out_l) f32 arrays (= W^T of each nn.Linear)
    """
    B, N, F_in = x.shape
    num_layers = len(weights)
    eps = 1e-5

    f_true = [F_in] + [int(w.shape[1]) for w in weights]

    # Pad N to a multiple of 16 (bf16 sublane packing) and feature dims to
    # multiples of 128 (lane-dense MXU N-dims and stores).
    LANE, SUB = 128, 16
    Np = _ceil_to(N, SUB)
    f_pad = [_ceil_to(f, LANE) for f in f_true]

    x_p = x if (Np == N and f_pad[0] == F_in) else jnp.pad(
        x, ((0, 0), (0, Np - N), (0, f_pad[0] - F_in)))
    adj_p = adj if Np == N else jnp.pad(
        adj, ((0, 0), (0, Np - N), (0, Np - N)))

    # Pre-pad (zero rows/cols) and pre-cast weights to bf16.
    w_p = [
        jnp.pad(w, ((0, f_pad[i] - int(w.shape[0])),
                    (0, f_pad[i + 1] - int(w.shape[1])))).astype(jnp.bfloat16)
        for i, w in enumerate(weights)
    ]

    # Per-layer matmul association: put the smaller feature dim on the bmm.
    adj_first = tuple(
        (f_pad[i], f_true[i]) < (f_pad[i + 1], f_true[i + 1])
        for i in range(num_layers))

    # Generation-aware VMEM budget (v7x: 64 MiB/TC + 2 TCs; v5e/v6e: 128 MiB, 1 TC).
    try:
        vmem_cap = int(pltpu.get_tpu_info().vmem_capacity_bytes)
    except Exception:
        vmem_cap = 64 * 1024 * 1024
    is_v7x = vmem_cap <= 64 * 1024 * 1024
    budget = int((0.4 if is_v7x else 0.6) * vmem_cap)

    if batch_block is None:
        Bt = _pick_batch_block(B, Np, f_pad, num_layers, budget, multi_core=is_v7x)
        if Bt is None:
            # TODO(synk): add an N-tiling fallback (second "arbitrary" grid axis
            # over adjacency row tiles) for very large graphs on v7x's 64 MiB VMEM.
            raise ValueError(
                "GCN tile for a single batch element "
                f"(~{_estimate_vmem_bytes(1, Np, f_pad, num_layers) / 2**20:.1f} MiB) "
                f"exceeds the VMEM budget ({budget / 2**20:.1f} MiB); "
                "N-tiling is not implemented.")
    else:
        Bt = batch_block
    assert B % Bt == 0, (B, Bt)
    grid = (B // Bt,)

    # On v7x with >=2 fused layers and a big adjacency tile, the adj DMA is
    # amortized over all layers of N^2*F compute: drop its second pipeline
    # buffer and let the reclaimed VMEM go to a larger block.
    adj_spec_kwargs = {}
    if is_v7x and num_layers >= 2 and Bt * Np * Np * 4 > 4 * 1024 * 1024:
        adj_spec_kwargs["pipeline_mode"] = pl.Buffered(1)

    in_specs = [
        pl.BlockSpec((Bt, Np, f_pad[0]), lambda b: (b, 0, 0)),
        pl.BlockSpec((Bt, Np, Np), lambda b: (b, 0, 0), **adj_spec_kwargs),
    ] + [pl.BlockSpec(w.shape, lambda b: (0, 0)) for w in w_p]
    out_specs = pl.BlockSpec((Bt, Np, f_pad[-1]), lambda b: (b, 0, 0))

    compiler_kwargs = dict(dimension_semantics=("parallel",))
    est = _estimate_vmem_bytes(Bt, Np, f_pad, num_layers)
    # v5e's default scoped VMEM limit is ~16 MiB (v6e/v7x ~32 MiB): raise the
    # limit whenever the estimate exceeds the smallest default, with headroom.
    if est > 16 * 1024 * 1024:
        compiler_kwargs["vmem_limit_bytes"] = int(
            min(0.75 * vmem_cap, max(2 * est, 32 * 1024 * 1024)))

    kernel = functools.partial(
        _gcn_fused_kernel,
        num_layers=num_layers,
        f_outs=tuple(f_true[1:]),
        adj_first=adj_first,
        eps=eps,
    )
    out_p = pl.pallas_call(
        kernel,
        out_shape=jax.ShapeDtypeStruct((B, Np, f_pad[-1]), jnp.float32),
        grid_spec=pltpu.PrefetchScalarGridSpec(
            num_scalar_prefetch=0,
            grid=grid,
            in_specs=in_specs,
            out_specs=out_specs,
            scratch_shapes=[pltpu.VMEM((Bt, Np, Np), jnp.bfloat16)],
        ),
        compiler_params=pltpu.CompilerParams(**compiler_kwargs),
    )(x_p, adj_p, *w_p)

    if Np == N and f_pad[-1] == f_true[-1]:
        return out_p
    return out_p[:, :N, :f_true[-1]]


def _reference_forward(x, adj, weights, eps=1e-5):
    """Pure-JAX f32 reference mirroring the PyTorch module (eval mode)."""
    for w in weights:
        support = jnp.einsum("bnf,fo->bno", x, w)
        out = jnp.einsum("bnm,bmo->bno", adj, support)
        mean = jnp.mean(out, axis=-1, keepdims=True)
        var = jnp.mean((out - mean) ** 2, axis=-1, keepdims=True)
        out = (out - mean) / jnp.sqrt(var + eps)
        x = jnp.maximum(out, 0.0)
    return x


if __name__ == "__main__":
    # GCN(input_size, hidden, num_classes, num_layers=1)
    #   -> layers: input->hidden, hidden->num_classes.
    B, N = 2, 16
    input_size = 8
    hidden_size = 32
    num_classes = 16

    key = jax.random.PRNGKey(0)
    kx, kadj, kw1, kw2 = jax.random.split(key, 4)

    x = jax.random.normal(kx, (B, N, input_size), dtype=jnp.float32)

    # Row-normalized adjacency (deterministic).
    adj_raw = jax.random.uniform(kadj, (B, N, N), dtype=jnp.float32)
    adj = adj_raw / jnp.sum(adj_raw, axis=-1, keepdims=True)

    # Deterministic weight init, stored as (F_in, F_out) (= W^T of nn.Linear).
    w1 = (jax.random.normal(kw1, (input_size, hidden_size), dtype=jnp.float32)
          * (1.0 / jnp.sqrt(input_size)))
    w2 = (jax.random.normal(kw2, (hidden_size, num_classes), dtype=jnp.float32)
          * (1.0 / jnp.sqrt(hidden_size)))
    weights = [w1, w2]

    out = gcn_forward(x, adj, weights)
    out = jax.block_until_ready(out)

    ref = _reference_forward(x, adj, weights)
    assert out.shape == (B, N, num_classes), out.shape
    # bf16 matmul inputs (f32 accumulation) -> slightly looser tolerance vs f32 ref.
    assert jnp.allclose(out, ref, atol=5e-2, rtol=5e-2), \
        float(jnp.max(jnp.abs(out - ref)))

    print("KERNEL_OK")
</pallas_src>

<mosaic_0001>
module attributes {stable_mosaic.version = 11 : i64} {
  func.func @_gcn_fused_kernel(%arg0: i32, %arg1: memref<1x16x128xf32, #tpu.memory_space<vmem>>, %arg2: memref<1x16x16xf32, #tpu.memory_space<vmem>>, %arg3: memref<128x128xbf16, #tpu.memory_space<vmem>>, %arg4: memref<128x128xbf16, #tpu.memory_space<vmem>>, %arg5: memref<1x16x128xf32, #tpu.memory_space<vmem>>, %arg6: memref<1x16x16xbf16, #tpu.memory_space<vmem>>) attributes {dimension_semantics = [#tpu.dimension_semantics<parallel>], iteration_bounds = array<i64: 2>, scalar_prefetch = 0 : i64, scratch_operands = 1 : i64, tpu.core_type = #tpu.core_type<tc>, window_params = [{transform_indices = @transform_0, window_bounds = array<i64: 1, 16, 128>}, {transform_indices = @transform_1, window_bounds = array<i64: 1, 16, 16>}, {pipeline_mode = #tpu.pipeline_mode<synchronous>, transform_indices = @transform_2, window_bounds = array<i64: 128, 128>}, {pipeline_mode = #tpu.pipeline_mode<synchronous>, transform_indices = @transform_3, window_bounds = array<i64: 128, 128>}, {transform_indices = @transform_4, window_bounds = array<i64: 1, 16, 128>}]} {
    %c0 = arith.constant 0 : index
    %c0_0 = arith.constant 0 : index
    %c0_1 = arith.constant 0 : index
    %0 = vector.load %arg2[%c0, %c0_0, %c0_1] : memref<1x16x16xf32, #tpu.memory_space<vmem>>, vector<1x16x16xf32>
    %1 = arith.truncf %0 : vector<1x16x16xf32> to vector<1x16x16xbf16>
    %c0_2 = arith.constant 0 : index
    %c0_3 = arith.constant 0 : index
    %c0_4 = arith.constant 0 : index
    %2 = vector.load %arg6[%c0_2, %c0_3, %c0_4] : memref<1x16x16xbf16, #tpu.memory_space<vmem>>, vector<1x16x16xbf16>
    tpu.vector_store %arg6[%c0_2, %c0_3, %c0_4], %1 {strides = array<i32>} : memref<1x16x16xbf16, #tpu.memory_space<vmem>>, vector<1x16x16xbf16>,
    %c0_5 = arith.constant 0 : index
    %c0_6 = arith.constant 0 : index
    %c0_7 = arith.constant 0 : index
    %3 = vector.load %arg1[%c0_5, %c0_6, %c0_7] : memref<1x16x128xf32, #tpu.memory_space<vmem>>, vector<1x16x128xf32>
    %4 = vector.shape_cast %3 : vector<1x16x128xf32> to vector<16x128xf32>
    %c0_8 = arith.constant 0 : index
    %c0_9 = arith.constant 0 : index
    %5 = vector.load %arg3[%c0_8, %c0_9] : memref<128x128xbf16, #tpu.memory_space<vmem>>, vector<128x128xbf16>
    %c0_10 = arith.constant 0 : index
    %c0_11 = arith.constant 0 : index
    %c0_12 = arith.constant 0 : index
    %6 = vector.load %arg6[%c0_10, %c0_11, %c0_12] : memref<1x16x16xbf16, #tpu.memory_space<vmem>>, vector<1x16x16xbf16>
    %7 = arith.truncf %4 : vector<16x128xf32> to vector<16x128xbf16>
    %8 = vector.shape_cast %7 : vector<16x128xbf16> to vector<1x16x128xbf16>
    "tpu.trace_start"() <{level = 10 : i32, message = "bnm,bmf->bnf"}> : () -> ()
    %cst = arith.constant dense<0.000000e+00> : vector<1x16x128xf32>
    %9 = tpu.matmul %6, %8, %cst {dimension_numbers = #tpu.dot_dimension_numbers<[2], [1], [1], [2], [0, 0, 0, 1, 1, 2], [0], [0]>} : vector<1x16x16xbf16>, vector<1x16x128xbf16>, vector<1x16x128xf32> -> vector<1x16x128xf32>
    "tpu.trace_stop"() : () -> ()
    %10 = vector.shape_cast %9 : vector<1x16x128xf32> to vector<16x128xf32>
    %11 = arith.truncf %10 : vector<16x128xf32> to vector<16x128xbf16>
    %cst_13 = arith.constant dense<0.000000e+00> : vector<16x128xf32>
    %12 = tpu.matmul %11, %5, %cst_13 {dimension_numbers = #tpu.dot_dimension_numbers<[1], [0], [0], [1], [0, 0, 1, 1], [], []>} : vector<16x128xbf16>, vector<128x128xbf16>, vector<16x128xf32> -> vector<16x128xf32>
    %cst_14 = arith.constant dense<0.000000e+00> : vector<16xf32>
    %13 = vector.multi_reduction <add>, %12, %cst_14 [1] : vector<16x128xf32> to vector<16xf32>
    %14 = vector.shape_cast %13 : vector<16xf32> to vector<16x1xf32>
    %15 = arith.mulf %12, %12 : vector<16x128xf32>
    %cst_15 = arith.constant dense<0.000000e+00> : vector<16xf32>
    %16 = vector.multi_reduction <add>, %15, %cst_15 [1] : vector<16x128xf32> to vector<16xf32>
    %17 = vector.shape_cast %16 : vector<16xf32> to vector<16x1xf32>
    %cst_16 = arith.constant 3.125000e-02 : f32
    %18 = vector.broadcast %cst_16 : f32 to vector<16x1xf32>
    %19 = arith.mulf %14, %18 : vector<16x1xf32>
    %cst_17 = arith.constant 3.125000e-02 : f32
    %20 = vector.broadcast %cst_17 : f32 to vector<16x1xf32>
    %21 = arith.mulf %17, %20 : vector<16x1xf32>
    %22 = arith.mulf %19, %19 : vector<16x1xf32>
    %23 = arith.subf %21, %22 : vector<16x1xf32>
    %cst_18 = arith.constant 0.000000e+00 : f32
    %24 = vector.broadcast %cst_18 : f32 to vector<16x1xf32>
    %25 = arith.maximumf %23, %24 : vector<16x1xf32>
    %26 = vector.broadcast %19 : vector<16x1xf32> to vector<16x128xf32>
    %27 = arith.subf %12, %26 : vector<16x128xf32>
    %cst_19 = arith.constant 9.99999974E-6 : f32
    %28 = vector.broadcast %cst_19 : f32 to vector<16x1xf32>
    %29 = arith.addf %25, %28 : vector<16x1xf32>
    %30 = math.rsqrt %29 : vector<16x1xf32>
    %31 = vector.broadcast %30 : vector<16x1xf32> to vector<16x128xf32>
    %32 = arith.mulf %27, %31 : vector<16x128xf32>
    %cst_20 = arith.constant 0.000000e+00 : f32
    %33 = vector.broadcast %cst_20 : f32 to vector<16x128xf32>
    %34 = arith.maximumf %32, %33 : vector<16x128xf32>
    %c0_21 = arith.constant 0 : index
    %c0_22 = arith.constant 0 : index
    %35 = vector.load %arg4[%c0_21, %c0_22] : memref<128x128xbf16, #tpu.memory_space<vmem>>, vector<128x128xbf16>
    %c0_23 = arith.constant 0 : index
    %c0_24 = arith.constant 0 : index
    %c0_25 = arith.constant 0 : index
    %36 = vector.load %arg6[%c0_23, %c0_24, %c0_25] : memref<1x16x16xbf16, #tpu.memory_space<vmem>>, vector<1x16x16xbf16>
    %37 = arith.truncf %34 : vector<16x128xf32> to vector<16x128xbf16>
    %cst_26 = arith.constant dense<0.000000e+00> : vector<16x128xf32>
    %38 = tpu.matmul %37, %35, %cst_26 {dimension_numbers = #tpu.dot_dimension_numbers<[1], [0], [0], [1], [0, 0, 1, 1], [], []>} : vector<16x128xbf16>, vector<128x128xbf16>, vector<16x128xf32> -> vector<16x128xf32>
    %39 = vector.shape_cast %38 : vector<16x128xf32> to vector<1x16x128xf32>
    %40 = arith.truncf %39 : vector<1x16x128xf32> to vector<1x16x128xbf16>
    "tpu.trace_start"() <{level = 10 : i32, message = "bnm,bmf->bnf"}> : () -> ()
    %cst_27 = arith.constant dense<0.000000e+00> : vector<1x16x128xf32>
    %41 = tpu.matmul %36, %40, %cst_27 {dimension_numbers = #tpu.dot_dimension_numbers<[2], [1], [1], [2], [0, 0, 0, 1, 1, 2], [0], [0]>} : vector<1x16x16xbf16>, vector<1x16x128xbf16>, vector<1x16x128xf32> -> vector<1x16x128xf32>
    "tpu.trace_stop"() : () -> ()
    %42 = vector.shape_cast %41 : vector<1x16x128xf32> to vector<16x128xf32>
    %cst_28 = arith.constant dense<0.000000e+00> : vector<16xf32>
    %43 = vector.multi_reduction <add>, %42, %cst_28 [1] : vector<16x128xf32> to vector<16xf32>
    %44 = vector.shape_cast %43 : vector<16xf32> to vector<16x1xf32>
    %45 = arith.mulf %42, %42 : vector<16x128xf32>
    %cst_29 = arith.constant dense<0.000000e+00> : vector<16xf32>
    %46 = vector.multi_reduction <add>, %45, %cst_29 [1] : vector<16x128xf32> to vector<16xf32>
    %47 = vector.shape_cast %46 : vector<16xf32> to vector<16x1xf32>
    %cst_30 = arith.constant 6.250000e-02 : f32
    %48 = vector.broadcast %cst_30 : f32 to vector<16x1xf32>
    %49 = arith.mulf %44, %48 : vector<16x1xf32>
    %cst_31 = arith.constant 6.250000e-02 : f32
    %50 = vector.broadcast %cst_31 : f32 to vector<16x1xf32>
    %51 = arith.mulf %47, %50 : vector<16x1xf32>
    %52 = arith.mulf %49, %49 : vector<16x1xf32>
    %53 = arith.subf %51, %52 : vector<16x1xf32>
    %cst_32 = arith.constant 0.000000e+00 : f32
    %54 = vector.broadcast %cst_32 : f32 to vector<16x1xf32>
    %55 = arith.maximumf %53, %54 : vector<16x1xf32>
    %56 = vector.broadcast %49 : vector<16x1xf32> to vector<16x128xf32>
    %57 = arith.subf %42, %56 : vector<16x128xf32>
    %cst_33 = arith.constant 9.99999974E-6 : f32
    %58 = vector.broadcast %cst_33 : f32 to vector<16x1xf32>
    %59 = arith.addf %55, %58 : vector<16x1xf32>
    %60 = math.rsqrt %59 : vector<16x1xf32>
    %61 = vector.broadcast %60 : vector<16x1xf32> to vector<16x128xf32>
    %62 = arith.mulf %57, %61 : vector<16x128xf32>
    %cst_34 = arith.constant 0.000000e+00 : f32
    %63 = vector.broadcast %cst_34 : f32 to vector<16x128xf32>
    %64 = arith.maximumf %62, %63 : vector<16x128xf32>
    %65 = vector.shape_cast %64 : vector<16x128xf32> to vector<1x16x128xf32>
    %c0_35 = arith.constant 0 : index
    %c0_36 = arith.constant 0 : index
    %c0_37 = arith.constant 0 : index
    %66 = vector.load %arg5[%c0_35, %c0_36, %c0_37] : memref<1x16x128xf32, #tpu.memory_space<vmem>>, vector<1x16x128xf32>
    tpu.vector_store %arg5[%c0_35, %c0_36, %c0_37], %65 {strides = array<i32>} : memref<1x16x128xf32, #tpu.memory_space<vmem>>, vector<1x16x128xf32>,
    return
  }
  func.func @transform_0(%arg0: i32) -> (i32, i32, i32) {
    %c0_i32 = arith.constant 0 : i32
    %c0_i32_0 = arith.constant 0 : i32
    %c0_i32_1 = arith.constant 0 : i32
    return %arg0, %c0_i32, %c0_i32_0 : i32, i32, i32
  }
  func.func @transform_1(%arg0: i32) -> (i32, i32, i32) {
    %c0_i32 = arith.constant 0 : i32
    %c0_i32_0 = arith.constant 0 : i32
    %c0_i32_1 = arith.constant 0 : i32
    return %arg0, %c0_i32, %c0_i32_0 : i32, i32, i32
  }
  func.func @transform_2(%arg0: i32) -> (i32, i32) {
    %c0_i32 = arith.constant 0 : i32
    %c0_i32_0 = arith.constant 0 : i32
    %c0_i32_1 = arith.constant 0 : i32
    return %c0_i32, %c0_i32_0 : i32, i32
  }
  func.func @transform_3(%arg0: i32) -> (i32, i32) {
    %c0_i32 = arith.constant 0 : i32
    %c0_i32_0 = arith.constant 0 : i32
    %c0_i32_1 = arith.constant 0 : i32
    return %c0_i32, %c0_i32_0 : i32, i32
  }
  func.func @transform_4(%arg0: i32) -> (i32, i32, i32) {
    %c0_i32 = arith.constant 0 : i32
    %c0_i32_0 = arith.constant 0 : i32
    %c0_i32_1 = arith.constant 0 : i32
    return %arg0, %c0_i32, %c0_i32_0 : i32, i32, i32
  }
}

</mosaic_0001>

<bundles_post_ra>
// kernel: tpu_custom_call.1
= control target key start
LH: loop header
LB: loop body
LE: loop exit
PB: predicated region body
PF: predicated region fallthrough
CT: control target
= control target key end

     0   :  { %s1572_s0 = inlined_call_operand.hbm [shape: f32[2,16,128], index: 0, kind: input, shape index: {}]   ;;  %s1573_s1 = inlined_call_operand.hbm [shape: f32[2,16,16], index: 1, kind: input, shape index: {}]   ;;  %s1574_s2 = inlined_call_operand.hbm [shape: bf16[128,128], index: 2, kind: input, shape index: {}]   ;;  %s1575_s3 = inlined_call_operand.hbm [shape: bf16[128,128], index: 3, kind: input, shape index: {}]   ;;  %s1576_s4 = inlined_call_operand.hbm [shape: f32[2,16,128], index: 4, kind: output, shape index: {}]  }
   0x1   :  { %1580 = sst [smem:[#allocation17_spill]] %s1572_s0 }
   0x2   :  { %9 = vsyncpa [#allocation4], 0 }
   0x3   :  { %11 = vsyncpa [#allocation4 + $0x1], 0 }
   0x4   :  { %12 = vsyncpa [#allocation7], 0 }
   0x5   :  { %14 = vsyncpa [#allocation7 + $0x1], 0 }
   0x6   :  { %15 = vsyncpa [#allocation10], 0 }
   0x7   :  { %16 = vsyncpa [#allocation5], 0 }
   0x8   :  { %18 = vsyncpa [#allocation5 + $0x1], 0  ;;  %s1243_s15 = smov 0   ;;  %s1245_s16 = smov 0  }
   0x9   :  { %s1247_s17 = smov 0   ;;  %s1249_s18 = smov 0  }
   0xa LB: > { %s1264_s19 = sadd.s32 4294967295, %s1203_s18   ;;  %s788_s20 = sadd.s32 4294967294, %s1203_s18   ;;  %s1203_s18 = sphi %s1249_s18, %s1600_s18   ;;  %s1199_s17 = sphi %s1247_s17, %s1599_s17   ;;  %s1195_s16 = sphi %s1245_s16, %s1598_s16   ;;  %s1191_s15 = sphi %s1243_s15, %s1597_s15  }
   0xb   : > { %p44_p0 = scmp.ne.s32.totalorder %s1195_s16, %s1191_s15  ;;  %p1577_p1 = scmp.eq.s32.totalorder %s1264_s19, 0 }
   0xc   : > { %p142_p3 = scmp.eq.s32.totalorder %s788_s20, 1  ;;  %p789_p5 = scmp.ge.s32.totalorder %s1203_s18, 1 }
   0xd   : > { %p1273_p4 = por %p1577_p1, %p44_p0  ;;  %p149_p7 = scmp.lt.s32.totalorder %s1203_s18, 3 }
   0xe   : > { %p1278_p6 = por %p142_p3, %p44_p0  ;;  %s1205_s24 = smov [#allocation8]  }
   0xf   : > { %s1581_s21 = scalar_select %p1273_p4, 1, 0 }
  0x10   : > { %s1582_s22 = scalar_select %p1278_p6, 1, 0 }
  0x11   : > { %p1283_p8 = pnand %p789_p5, %p149_p7  ;;  %s161_s25 = sshll.u32 %s1205_s24, 4  ;;  %s1287_s25 = int_to_ptr.vmem [resolvable:$true] %s161_s25 }
  0x12   : > { %s1206_s27 = smov [#allocation9]   ;;  %s1009_s5 = scalar_lea.hbm %s1574_s2, 1024 }
  0x13   : > { %p919_p9 = pneg %p1283_p8  ;;  %s174_s28 = sshll.u32 %s1206_s27, 4  ;;  %s1298_s28 = int_to_ptr.vmem [resolvable:$true] %s174_s28 }
  0x14   : > { %p1010_p12 = scmp.ne.s32.totalorder %s1574_s2, %s1009_s5  ;;  %p1016_p5 = scmp.lt.u32.totalorder %s1009_s5, %s1574_s2 }
  0x15   : > { %p1294_p11 = pnand %p919_p9, %p1577_p1 }
  0x17   : > { %p1011_p13 = pneg %p1294_p11 }
  0x19   : > { %p1012_p0 = pnand %p1011_p13, %p1010_p12 }
  0x1b   : > { %p1013_p3 = pneg %p1012_p0 }
  0x1d   : > { %p1018_p7 = pnand %p1016_p5, %p1013_p3 }
  0x1f   : > { %1021 = shalt.err (!%p1018_p7)
}
  0x20   : > { %s1022_s10 = scalar_lea.vmem %s1287_s25, 1024  ;;  %p1030_p2 = scmp.lt.s32.totalorder %s1287_s25, %s1287_s25 }
  0x21   : > { %p1023_p9 = scmp.ne.s32.totalorder %s1287_s25, %s1022_s10  ;;  %p1031_p12 = scmp.lt.s32.totalorder %s1022_s10, %s1022_s10 }
  0x23   : > { %p1025_p10 = pnand %p1023_p9, %p1011_p13  ;;  %p1032_p0 = por %p1031_p12, %p1030_p2 }
  0x25   : > { %p1026_p1 = pneg %p1025_p10 }
  0x27   : > { %p1033_p6 = pnand %p1032_p0, %p1026_p1 }
  0x29   : > { %1036 = shalt.err (!%p1033_p6)
}
  0x2a   : > { %s1207_s11 = smov 64   ;;  %s1208_s12 = smov 4  }
  0x2b   : > { %922 = dma.hbm_to_vmem [thread:$0]  (!%p1294_p11), %s1574_s2, 1024, %s1287_s25, [#allocation7], %s1207_s11, %s1207_s11, %s1208_s12  }
  0x2c   : > { %s1037_s27 = scalar_lea.hbm %s1575_s3, 1024 }
  0x2d   : > { %p1038_p2 = scmp.ne.s32.totalorder %s1575_s3, %s1037_s27  ;;  %p1044_p10 = scmp.lt.u32.totalorder %s1037_s27, %s1575_s3 }
  0x2f   : > { %p1040_p1 = pnand %p1038_p2, %p1011_p13 }
  0x31   : > { %p1041_p6 = pneg %p1040_p1 }
  0x33   : > { %p1046_p3 = pnand %p1044_p10, %p1041_p6 }
  0x35   : > { %1049 = shalt.err (!%p1046_p3)
}
  0x36   : > { %s1050_s25 = scalar_lea.vmem %s1298_s28, 1024  ;;  %p1058_p12 = scmp.lt.s32.totalorder %s1298_s28, %s1298_s28 }
  0x37   : > { %p1051_p5 = scmp.ne.s32.totalorder %s1298_s28, %s1050_s25  ;;  %p1059_p0 = scmp.lt.s32.totalorder %s1050_s25, %s1050_s25 }
  0x39   : > { %p1053_p7 = pnand %p1051_p5, %p1011_p13  ;;  %p1060_p2 = por %p1059_p0, %p1058_p12 }
  0x3b   : > { %p1054_p9 = pneg %p1053_p7 }
  0x3d   : > { %p1061_p1 = pnand %p1060_p2, %p1054_p9 }
  0x3f   : > { %1064 = shalt.err (!%p1061_p1)
}
  0x40   : > { %925 = dma.hbm_to_vmem [thread:$0]  (!%p1294_p11), %s1575_s3, 1024, %s1298_s28, [#allocation10], %s1207_s11, %s1207_s11, %s1208_s12  }
  0x41   : > { %s1353_s9 = sadd.s32 1, %s1203_s18   ;;  %s31_s26 = sadd.s32 1, %s1199_s17 }
  0x42   : > { %s28_s10 = ssub.s32 %s1203_s18, %s1353_s9  ;;  %p38_p13 = scmp.ne.s32.totalorder %s1199_s17, %s1195_s16 }
  0x43   : > { %p29_p6 = scmp.eq.s32.totalorder %s28_s10, 0  ;;  %p39_p10 = scmp.eq.s32.totalorder %s1203_s18, 0 }
  0x44   : > { %p1585_p3 = scmp.eq.s32.totalorder %s1264_s19, 1  ;;  %p939_p7 = scmp.lt.s32.totalorder %s1203_s18, 2 }
  0x45   : > { %s1369_s14 = scalar_select %p29_p6, %s1199_s17, %s31_s26  }
  0x46   : > { %p1363_p5 = por %p1585_p3, %p38_p13  ;;  %p40_p9 = por %p39_p10, %p38_p13 }
  0x47   : > { %s188_s20 = sand.u32 1, %s1199_s17   ;;  %s828_s28 = sshll.u32 %s1203_s18, 8 }
  0x48   : > { %s1586_s13 = scalar_select %p1363_p5, 1, 0 }
  0x49   : > { %s1372_s24 = sshll.u32 %s188_s20, 4  ;;  %s1587_s0 = sld [smem:[#allocation17_spill]] }
  0x4a   : > { %s192_s29 = scalar_lea.vmem [#allocation3], %s1372_s24  ;;  %p1385_p11 = pnand %p939_p7, %p40_p9 }
  0x4b   : > { %s199_s30 = sshll.u32 %s192_s29, 4  ;;  %s1389_s6 = scalar_lea.sflag [#allocation4], %s188_s20  ;;  %s1383_s30 = int_to_ptr.vmem [resolvable:$true] %s199_s30 }
  0x4c   : > { %p1067_p0 = pneg %p1385_p11 }
  0x4f   : > { %s1380_s27 = scalar_lea.hbm %s1587_s0, %s828_s28  ;;  %s1070_s26 = scalar_lea.hbm %s1587_s0, 512 }
  0x50   : > { %s1065_s25 = scalar_lea.hbm %s1380_s27, 256  ;;  %p1071_p13 = scmp.lt.u32.totalorder %s1380_s27, %s1587_s0 }
  0x51   : > { %p1066_p12 = scmp.ne.s32.totalorder %s1380_s27, %s1065_s25  ;;  %p1072_p6 = scmp.lt.u32.totalorder %s1070_s26, %s1065_s25 }
  0x52   : > { %p1074_p3 = scmp.lt.u32.totalorder %s1065_s25, %s1380_s27 }
  0x53   : > { %p1068_p2 = pnand %p1067_p0, %p1066_p12  ;;  %p1073_p10 = por %p1072_p6, %p1071_p13 }
  0x55   : > { %p1069_p1 = pneg %p1068_p2  ;;  %p1075_p7 = por %p1074_p3, %p1073_p10 }
  0x57   : > { %p1076_p9 = pnand %p1075_p7, %p1069_p1 }
  0x59   : > { %1079 = shalt.err (!%p1076_p9)
}
  0x5a   : > { %s1080_s20 = scalar_lea.vmem %s1383_s30, 256  ;;  %s1209_s12 = smov [#allocation3]  }
  0x5b   : > { %p1081_p12 = scmp.ne.s32.totalorder %s1383_s30, %s1080_s20  ;;  %s1085_s29 = sshll.u32 %s1209_s12, 4  ;;  %s1086_s29 = int_to_ptr.vmem [resolvable:$false] %s1085_s29 }
  0x5c   : > { %s1087_s7 = scalar_lea.vmem %s1086_s29, 512  ;;  %p1088_p4 = scmp.lt.s32.totalorder %s1383_s30, %s1086_s29 }
  0x5d   : > { %p1083_p2 = pnand %p1081_p12, %p1067_p0  ;;  %p1089_p13 = scmp.lt.s32.totalorder %s1087_s7, %s1080_s20 }
  0x5f   : > { %p1084_p5 = pneg %p1083_p2  ;;  %p1090_p6 = por %p1089_p13, %p1088_p4 }
  0x61   : > { %p1091_p10 = pnand %p1090_p6, %p1084_p5 }
  0x63   : > { %1094 = shalt.err (!%p1091_p10)
}
  0x64   : > { %s1210_s25 = smov 128   ;;  %s1211_s8 = smov 8  }
  0x65   : > { %929 = dma.hbm_to_vmem [thread:$0]  (!%p1385_p11), %s1380_s27, 256, %s1383_s30, %s1389_s6, %s1210_s25, %s1210_s25, %s1211_s8  }
  0x66   : > { %s1425_s11 = scalar_lea.hbm %s1573_s1, %s828_s28  ;;  %s213_s20 = scalar_lea.vmem [#allocation6], %s1372_s24 }
  0x67   : > { %s220_s12 = sshll.u32 %s213_s20, 4  ;;  %s209_s29 = sand.u32 1, %s1203_s18   ;;  %s1428_s12 = int_to_ptr.vmem [resolvable:$true] %s220_s12 }
  0x68   : > { %s1431_s7 = scalar_lea.sflag [#allocation7], %s209_s29  ;;  %s1095_s0 = scalar_lea.hbm %s1425_s11, 256 }
  0x69   : > { %p1096_p4 = scmp.ne.s32.totalorder %s1425_s11, %s1095_s0  ;;  %s1100_s30 = scalar_lea.hbm %s1573_s1, 512 }
  0x6a   : > { %p1101_p3 = scmp.lt.u32.totalorder %s1425_s11, %s1573_s1  ;;  %p1102_p7 = scmp.lt.u32.totalorder %s1100_s30, %s1095_s0 }
  0x6b   : > { %p1098_p5 = pnand %p1096_p4, %p1067_p0  ;;  %p1104_p12 = scmp.lt.u32.totalorder %s1095_s0, %s1425_s11 }
  0x6c   : > { %p1103_p9 = por %p1102_p7, %p1101_p3 }
  0x6d   : > { %p1099_p1 = pneg %p1098_p5 }
  0x6e   : > { %p1105_p2 = por %p1104_p12, %p1103_p9 }
  0x70   : > { %p1106_p13 = pnand %p1105_p2, %p1099_p1 }
  0x72   : > { %1109 = shalt.err (!%p1106_p13)
}
  0x73   : > { %s1110_s24 = scalar_lea.vmem %s1428_s12, 256  ;;  %s1212_s10 = smov [#allocation6]  }
  0x74   : > { %p1111_p6 = scmp.ne.s32.totalorder %s1428_s12, %s1110_s24  ;;  %s1115_s20 = sshll.u32 %s1212_s10, 4  ;;  %s1116_s20 = int_to_ptr.vmem [resolvable:$false] %s1115_s20 }
  0x75   : > { %s1117_s29 = scalar_lea.vmem %s1116_s20, 512  ;;  %p1118_p5 = scmp.lt.s32.totalorder %s1428_s12, %s1116_s20 }
  0x76   : > { %p1113_p10 = pnand %p1111_p6, %p1067_p0  ;;  %p1119_p3 = scmp.lt.s32.totalorder %s1117_s29, %s1110_s24 }
  0x78   : > { %p1114_p4 = pneg %p1113_p10  ;;  %p1120_p7 = por %p1119_p3, %p1118_p5 }
  0x7a   : > { %p1121_p9 = pnand %p1120_p7, %p1114_p4 }
  0x7c   : > { %1124 = shalt.err (!%p1121_p9)
}
  0x7d   : > { %932 = dma.hbm_to_vmem [thread:$0]  (!%p1385_p11), %s1425_s11, 256, %s1428_s12, %s1431_s7, %s1210_s25, %s1210_s25, %s1211_s8  }
  0x7e   : > { %232 = sbr.rel (%p1283_p8) target bundleno = 1373 (0x55d), region = 36  ;;  %s1463_s0 = sand.u32 (!%p1283_p8), 1, %s1195_s16  }
  0x7f   : > { %s1466_s27 = sshll.u32 (!%p1283_p8), %s1463_s0, 4  ;;  %s235_s5 = scalar_lea.sflag (!%p1283_p8), [#allocation4], %s1463_s0 }
  0x80   : > { %s238_s28 = scalar_lea.vmem (!%p1283_p8), [#allocation3], %s1466_s27  ;;  %p1589_p0 = scmp.ne.s32.totalorder (!%p1283_p8), %s1581_s21, 0 }
  0x85   : > { %1170 = dma.done.wait (%p1589_p0), %s235_s5, 256  }
  0x86   : > { %1172 = vsyncadd (%p1589_p0), %s235_s5, 4294967040  ;;  %s243_s23 = sand.u32 1, %s1264_s19   ;;  %s247_s8 = scalar_lea.vmem [#allocation6], %s1466_s27 }
  0x87   : > { %s244_s25 = scalar_lea.sflag [#allocation7], %s243_s23 }
  0x88   : > { %1174 = dma.done.wait (%p1589_p0), %s244_s25, 256  }
  0x89   : > { %1176 = vsyncadd (%p1589_p0), %s244_s25, 4294967040  ;;  %p1590_p8 = scmp.eq.s32.totalorder %s1264_s19, 0 }
  0x8b   : > { %1178 = dma.done.wait (%p1590_p8), [#allocation7], 1024   ;;  %p1591_p11 = pmov %p1590_p8 }
  0x8c   : > { %p1592_p1 = pmov %p1590_p8 }
  0x8d   : > { %1180 = vsyncadd (%p1591_p11), [#allocation7], 4294966272 }
  0x8e   : > { %1182 = dma.done.wait (%p1592_p1), [#allocation10], 1024   ;;  %p1593_p12 = pmov %p1592_p1 }
  0x8f   : > { %v1213_v0 = vmov 0.0   ;;  %vm1214_vm0 = vmmov 0   ;;  %v291_v1 = vld [vmem:[%s238_s28] sm:$0xff]  ;;  %v292_v2 = vld [vmem:[%s238_s28 + $0x8] sm:$0xff]  ;;  %vm289_vm1 = vcmask 130048   ;;  %s830_s21 = sshll.u32 %s1264_s19, 8 }
  0x90   : > { %1184 = vsyncadd (%p1593_p12), [#allocation10], 4294966272  ;;  %853 = vmatprep.subr.bf16.mxu0 %v1213_v0  ;;  %855 = vmatprep.mubr.msk.bf16.mxu0 %vm1214_vm0, %v1213_v0  ;;  %v286_v3 = vld [vmem:[%s247_s8] sm:$0xff]  ;;  %v310_v4 = vpack.c.bf16 %v292_v2, %v291_v1  ;;  %v287_v5 = vld [vmem:[%s247_s8 + $0x8] sm:$0xff]  ;;  %s284_s11 = scalar_lea.vmem [#allocation11], %s1466_s27  ;;  %s1526_s6 = scalar_lea.hbm %s1576_s4, %s830_s21 }
  0x91   : > { %859 = vmatprep.subr.bf16.mxu1 %v1213_v0  ;;  %875 = vmatprep.mubr.msk.bf16.mxu1 %vm1214_vm0, %v1213_v0  ;;  %v288_v6 = vpack.c.bf16 %v287_v5, %v286_v3  ;;  %v985_v7 = vld [vmem:[#allocation8] sm:$0xff]   ;;  %v986_v8 = vld [vmem:[#allocation8 + $0x8] sm:$0xff]   ;;  %v987_v9 = vld [vmem:[#allocation8 + $0x10] sm:$0xff]   ;;  %s673_s12 = sshll.u32 %s284_s11, 4  ;;  %s660_s26 = scalar_lea.sflag [#allocation5], %s1463_s0  ;;  %s1528_s12 = int_to_ptr.vmem [resolvable:$true] %s673_s12 }
  0x92   : > { %854 = vmatpush3.bf16.msra.mxu0 %v310_v4  ;;  %860 = vmatpush3.bf16.msra.mxu1 %v985_v7  ;;  %v988_v10 = vld [vmem:[#allocation8 + $0x18] sm:$0xff]   ;;  %v989_v12 = vld [vmem:[#allocation8 + $0x20] sm:$0xff]   ;;  %v990_v13 = vld [vmem:[#allocation8 + $0x28] sm:$0xff]   ;;  %s1125_s19 = scalar_lea.vmem %s1528_s12, 256  ;;  %p1594_p13 = scmp.ne.s32.totalorder %s1586_s13, 0 }
  0x93   : > { %290 = vst.msk [vmem:[#allocation2] sm:$0xff] %vm289_vm1, %v288_v6  ;;  %879 = vmatprep.subr.bf16.mxu0 %v1213_v0  ;;  %861 = vmatprep.subr.bf16.mxu1 %v1213_v0  ;;  %v991_v14 = vld [vmem:[#allocation8 + $0x30] sm:$0xff]   ;;  %v992_v15 = vld [vmem:[#allocation8 + $0x38] sm:$0xff]   ;;  %v993_v27 = vld [vmem:[#allocation9] sm:$0xff]   ;;  %p1126_p2 = scmp.ne.s32.totalorder %s1528_s12, %s1125_s19  ;;  %s1215_s24 = smov [#allocation11]  }
  0x94   : > { %v994_v28 = vld [vmem:[#allocation9 + $0x8] sm:$0xff]   ;;  %v995_v29 = vld [vmem:[#allocation9 + $0x10] sm:$0xff]   ;;  %v996_v30 = vld [vmem:[#allocation9 + $0x18] sm:$0xff]   ;;  %s1129_s10 = sshll.u32 %s1215_s24, 4  ;;  %s1130_s10 = int_to_ptr.vmem [resolvable:$false] %s1129_s10 }
  0x95   : > { %v997_v31 = vld [vmem:[#allocation9 + $0x20] sm:$0xff]   ;;  %v998_v32 = vld [vmem:[#allocation9 + $0x28] sm:$0xff]   ;;  %v999_v33 = vld [vmem:[#allocation9 + $0x30] sm:$0xff]   ;;  %p1127_p6 = pnand %p1126_p2, %p1594_p13  ;;  %s1131_s20 = scalar_lea.vmem %s1130_s10, 512 }
  0x96   : > { %862 = vmatpush3.bf16.msra.mxu1 %v986_v8  ;;  %v1000_v34 = vld [vmem:[#allocation9 + $0x38] sm:$0xff]   ;;  %p1132_p4 = scmp.lt.s32.totalorder %s1528_s12, %s1130_s10  ;;  %p1133_p5 = scmp.lt.s32.totalorder %s1131_s20, %s1125_s19 }
  0x97   : > { %863 = vmatprep.subr.bf16.mxu1 %v1213_v0  ;;  %p1128_p10 = pneg %p1127_p6 }
  0x98   : > { %p1134_p3 = por %p1133_p5, %p1132_p4 }
  0x9a   : > { %v1498_v11 = vld [vmem:[#allocation2] sm:$0xff]  ;;  %864 = vmatpush3.bf16.msra.mxu1 %v987_v9  ;;  %p1135_p7 = pnand %p1134_p3, %p1128_p10 }
  0x9b   : > { %856 = vmatmul.mubr.msk.bf16.vlgmr.msra.gmra.mrb[0].mxu0 %vm289_vm1, %v1498_v11  ;;  %865 = vmatprep.subr.bf16.mxu1 %v1213_v0 }
  0x9c   : > { %895 = vmatprep.mubr.msk.bf16.mxu0 %vm1214_vm0, %v1213_v0  ;;  %880 = vmatpush3.bf16.msra.mxu0 %v993_v27 }
  0x9d   : > { %881 = vmatprep.subr.bf16.mxu0 %v1213_v0 }
  0x9e   : > { %866 = vmatpush3.bf16.msra.mxu1 %v988_v10 }
  0x9f   : > { %867 = vmatprep.subr.bf16.mxu1 %v1213_v0 }
  0xa0   : > { %882 = vmatpush3.bf16.msra.mxu0 %v994_v28 }
  0xa1   : > { %883 = vmatprep.subr.bf16.mxu0 %v1213_v0 }
  0xa2   : > { %868 = vmatpush3.bf16.msra.mxu1 %v989_v12 }
  0xa3   : > { %869 = vmatprep.subr.bf16.mxu1 %v1213_v0 }
  0xa4   : > { %884 = vmatpush3.bf16.msra.mxu0 %v995_v29 }
  0xa5   : > { %885 = vmatprep.subr.bf16.mxu0 %v1213_v0 }
  0xa6   : > { %870 = vmatpush3.bf16.msra.mxu1 %v990_v13 }
  0xa7   : > { %871 = vmatprep.subr.bf16.mxu1 %v1213_v0 }
  0xa8   : > { %886 = vmatpush3.bf16.msra.mxu0 %v996_v30 }
  0xa9   : > { %887 = vmatprep.subr.bf16.mxu0 %v1213_v0 }
  0xaa   : > { %872 = vmatpush3.bf16.msra.mxu1 %v991_v14 }
  0xab   : > { %873 = vmatprep.subr.bf16.mxu1 %v1213_v0 }
  0xac   : > { %888 = vmatpush3.bf16.msra.mxu0 %v997_v31 }
  0xad   : > { %889 = vmatprep.subr.bf16.mxu0 %v1213_v0 }
  0xae   : > { %874 = vmatpush3.bf16.msra.mxu1 %v992_v15 }
  0xaf   : > { %899 = vmatprep.subr.bf16.mxu1 %v1213_v0 }
  0xb0   : > { %890 = vmatpush3.bf16.msra.mxu0 %v998_v32 }
  0xb1   : > { %891 = vmatprep.subr.bf16.mxu0 %v1213_v0 }
  0xb4   : > { %892 = vmatpush3.bf16.msra.mxu0 %v999_v33 }
  0xb5   : > { %893 = vmatprep.subr.bf16.mxu0 %v1213_v0 }
  0xb8   : > { %894 = vmatpush3.bf16.msra.mxu0 %v1000_v34 }
 0x16e   : > { %v348_v16 = vpop.f32.mrb[0].mxu0 }
 0x16f   : > { %v857_v17 = vpop.f32.mrb[1].mxu0 }
 0x170   : > { %v351_v18 = vpop.f32.mrb[2].mxu0 }
 0x171   : > { %v355_v19 = vpack.c.bf16 %v351_v18, %v348_v16  ;;  %v858_v20 = vpop.f32.mrb[3].mxu0 }
 0x173   : > { %876 = vmatmul.mubr.bf16.vlgmr.msra.gmra.mrb[0].mxu1 %v355_v19 }
 0x174   : > { %901 = vmatprep.mubr.msk.bf16.mxu1 %vm1214_vm0, %v1213_v0 }
 0x246   : > { %v438_v21 = vpop.f32.mrb[0].mxu1 }
 0x247   : > { %445 = vadd.xlane.f32.xlu0 %v438_v21  ;;  %v877_v22 = vpop.f32.mrb[1].mxu1  ;;  %v449_v23 = vmul.f32 %v438_v21, %v438_v21 }
 0x248   : > { %v441_v24 = vpop.f32.mrb[2].mxu1 }
 0x249   : > { %451 = vadd.xlane.f32.xlu1 %v449_v23  ;;  %v878_v25 = vpop.f32.mrb[3].mxu1  ;;  %v450_v26 = vmul.f32 %v441_v24, %v441_v24 }
 0x24b   : > { %447 = vadd.xlane.f32.xlu0 %v441_v24 }
 0x24d   : > { %453 = vadd.xlane.f32.xlu1 %v450_v26 }
 0x2d4   : > { %v446_v35 = vpop.xlane.xlu0 %445 }
 0x2d5   : > { %v455_v36 = vmul.f32 0.03125, %v446_v35 }
 0x2d6   : > { %v452_v37 = vpop.xlane.xlu1 %451 }
 0x2d7   : > { %v459_v38 = vmul.f32 %v455_v36, %v455_v36  ;;  %v457_v39 = vmul.f32 0.03125, %v452_v37  ;;  %v465_v52 = vsub.f32 %v438_v21, %v455_v36 }
 0x2d8   : > { %v448_v40 = vpop.xlane.xlu0 %447 }
 0x2d9   : > { %v461_v41 = vsub.f32 %v457_v39, %v459_v38  ;;  %v456_v42 = vmul.f32 0.03125, %v448_v40 }
 0x2da   : > { %v454_v43 = vpop.xlane.xlu1 %453 }
 0x2db   : > { %v463_v44 = vmax.f32 %v461_v41, 0.0  ;;  %v460_v45 = vmul.f32 %v456_v42, %v456_v42  ;;  %v458_v46 = vmul.f32 0.03125, %v454_v43  ;;  %v466_v53 = vsub.f32 %v441_v24, %v456_v42 }
 0x2dd   : > { %v467_v47 = vadd.f32 1e-05, %v463_v44  ;;  %v462_v48 = vsub.f32 %v458_v46, %v460_v45 }
 0x2df   : > { %1001 = vrsqrt.f32 %v467_v47  ;;  %v464_v49 = vmax.f32 %v462_v48, 0.0 }
 0x2e1   : > { %v468_v50 = vadd.f32 1e-05, %v464_v49 }
 0x2e3   : > { %1003 = vrsqrt.f32 %v468_v50 }
 0x2e9   : > { %v1002_v51 = vpop.eup %1001 }
 0x2ea   : > { %v471_v54 = vmul.f32 %v1002_v51, %v465_v52 }
 0x2ec   : > { %v473_v57 = vmax.f32 %v471_v54, 0.0 }
 0x2ed   : > { %v1004_v55 = vpop.eup %1003 }
 0x2ee   : > { %v472_v56 = vmul.f32 %v1004_v55, %v466_v53 }
 0x2f0   : > { %v474_v58 = vmax.f32 %v472_v56, 0.0 }
 0x2f2   : > { %v492_v59 = vpack.c.bf16 %v474_v58, %v473_v57 }
 0x2f4   : > { %896 = vmatmul.mubr.bf16.vlgmr.msra.gmra.mrb[4].mxu0 %v492_v59 }
 0x3c7   : > { %v575_v60 = vpop.f32.mrb[4].mxu0 }
 0x3c8   : > { %v897_v61 = vpop.f32.mrb[5].mxu0 }
 0x3c9   : > { %v578_v62 = vpop.f32.mrb[6].mxu0 }
 0x3ca   : > { %v582_v63 = vpack.c.bf16 %v578_v62, %v575_v60  ;;  %v898_v0 = vpop.f32.mrb[7].mxu0 }
 0x3cc   : > { %900 = vmatpush3.bf16.msra.mxu1 %v582_v63 }
 0x3cf   : > { %902 = vmatmul.mubr.msk.bf16.vlgmr.msra.gmra.mrb[4].mxu1 %vm289_vm1, %v1498_v11 }
 0x4a2   : > { %v620_v1 = vpop.f32.mrb[4].mxu1 }
 0x4a3   : > { %627 = vadd.xlane.f32.xlu0 %v620_v1  ;;  %v903_v2 = vpop.f32.mrb[5].mxu1  ;;  %v631_v4 = vmul.f32 %v620_v1, %v620_v1 }
 0x4a4   : > { %v623_v3 = vpop.f32.mrb[6].mxu1 }
 0x4a5   : > { %629 = vadd.xlane.f32.xlu1 %v623_v3  ;;  %v904_v5 = vpop.f32.mrb[7].mxu1  ;;  %v632_v6 = vmul.f32 %v623_v3, %v623_v3 }
 0x4a7   : > { %633 = vadd.xlane.f32.xlu0 %v631_v4 }
 0x4a9   : > { %635 = vadd.xlane.f32.xlu1 %v632_v6 }
 0x530   : > { %v628_v7 = vpop.xlane.xlu0 %627 }
 0x531   : > { %v637_v8 = vmul.f32 0.0625, %v628_v7 }
 0x532   : > { %v630_v9 = vpop.xlane.xlu1 %629 }
 0x533   : > { %v638_v10 = vmul.f32 0.0625, %v630_v9  ;;  %v641_v13 = vmul.f32 %v637_v8, %v637_v8  ;;  %v647_v23 = vsub.f32 %v620_v1, %v637_v8 }
 0x534   : > { %v634_v12 = vpop.xlane.xlu0 %633 }
 0x535   : > { %v639_v14 = vmul.f32 0.0625, %v634_v12  ;;  %v642_v11 = vmul.f32 %v638_v10, %v638_v10  ;;  %v648_v25 = vsub.f32 %v623_v3, %v638_v10 }
 0x536   : > { %v636_v15 = vpop.xlane.xlu1 %635 }
 0x537   : > { %v643_v16 = vsub.f32 %v639_v14, %v641_v13  ;;  %v640_v17 = vmul.f32 0.0625, %v636_v15 }
 0x539   : > { %v645_v18 = vmax.f32 %v643_v16, 0.0  ;;  %v644_v19 = vsub.f32 %v640_v17, %v642_v11 }
 0x53b   : > { %v649_v20 = vadd.f32 1e-05, %v645_v18  ;;  %v646_v21 = vmax.f32 %v644_v19, 0.0 }
 0x53d   : > { %1005 = vrsqrt.f32 %v649_v20  ;;  %v650_v22 = vadd.f32 1e-05, %v646_v21 }
 0x53f   : > { %1007 = vrsqrt.f32 %v650_v22 }
 0x547   : > { %v1006_v24 = vpop.eup %1005 }
 0x548   : > { %v653_v26 = vmul.f32 %v1006_v24, %v647_v23 }
 0x549   : > { %v1008_v27 = vpop.eup %1007 }
 0x54a   : > { %v655_v28 = vmax.f32 %v653_v26, 0.0  ;;  %v654_v29 = vmul.f32 %v1008_v27, %v648_v25 }
 0x54c   : > { %v656_v30 = vmax.f32 %v654_v29, 0.0  ;;  %657 = vst [vmem:[%s284_s11] sm:$0xff] %v655_v28 }
 0x54e   : > { %658 = vst [vmem:[%s284_s11 + $0x8] sm:$0xff] %v656_v30 }
 0x54f   : > { %1138 = shalt.err (!%p1135_p7)
}
 0x550   : > { %s1139_s29 = scalar_lea.hbm %s1526_s6, 256  ;;  %s1143_s28 = scalar_lea.hbm %s1576_s4, 512 }
 0x551   : > { %p1140_p9 = scmp.ne.s32.totalorder %s1526_s6, %s1139_s29  ;;  %p1144_p11 = scmp.lt.u32.totalorder %s1526_s6, %s1576_s4 }
 0x552   : > { %p1145_p1 = scmp.lt.u32.totalorder %s1143_s28, %s1139_s29  ;;  %p1147_p2 = scmp.lt.u32.totalorder %s1139_s29, %s1526_s6 }
 0x553   : > { %p1141_p0 = pnand %p1140_p9, %p1594_p13 }
 0x554   : > { %p1146_p12 = por %p1145_p1, %p1144_p11 }
 0x555   : > { %p1142_p8 = pneg %p1141_p0 }
 0x556   : > { %p1148_p6 = por %p1147_p2, %p1146_p12 }
 0x558   : > { %p1149_p10 = pnand %p1148_p6, %p1142_p8 }
 0x55a   : > { %1152 = shalt.err (!%p1149_p10)
}
 0x55b   : > { %s1216_s8 = smov 128   ;;  %s1217_s21 = smov 8  }
 0x55c   : > { %917 = dma.vmem_to_hbm [thread:$0]  (%p1594_p13), %s1528_s12, 256, %s1526_s6, %s660_s26, %s1216_s8, %s1216_s8, %s1217_s21  }
 0x55d PF: > { %s688_s11 = sand.u32 1, %s1191_s15   ;;  %p1595_p4 = scmp.ne.s32.totalorder %s1582_s22, 0 }
 0x55e   : > { %p1596_p5 = scmp.ge.s32.totalorder %s1203_s18, 2  ;;  %s689_s7 = scalar_lea.sflag [#allocation5], %s688_s11 }
 0x560   : > { %p934_p3 = pnand %p1596_p5, %p1595_p4 }
 0x562   : > { %1186 = dma.done.wait (!%p934_p3), %s689_s7, 256  }
 0x563   : > { %1188 = vsyncadd (!%p934_p3), %s689_s7, 4294967040  ;;  %p21_p7 = scmp.ge.s32.totalorder %s1353_s9, 4   ;;  %s1597_s15 = smov %s1195_s16 }
 0x564   : > { %s1598_s16 = smov %s1199_s17  ;;  %s1599_s17 = smov %s1369_s14 }
 0x565   : > { %s1600_s18 = smov %s1353_s9  ;;  %23 = sbr.rel (!%p21_p7) target bundleno = 10 (0xa), region = 102 }
 0x56c   :  { %694 = vsyncpa [#allocation4], 1 }
 0x56d   :  { %696 = vsyncpa [#allocation4 + $0x1], 1 }
 0x56e   :  { %697 = vsyncpa [#allocation7], 1 }
 0x56f   :  { %699 = vsyncpa [#allocation7 + $0x1], 1 }
 0x570   :  { %700 = vsyncpa [#allocation10], 1 }
 0x571   :  { %701 = vsyncpa [#allocation5], 1 }
 0x572   :  { %703 = vsyncpa [#allocation5 + $0x1], 1 }

</bundles_post_ra>
